<compile_context>
chip_gen: v5e
topology: v5e:2x2
jax: 0.10.0
libtpu: 0.0.40
codegen_flags: <defaults>
</compile_context>

<pallas_src>
import functools

import jax
import jax.numpy as jnp
from jax.experimental import pallas as pl
from jax.experimental.pallas import tpu as pltpu


LANE = 128      # vreg lane width
SUBLANE = 8     # vreg sublanes (f32)


def _round_up(x, m):
    return ((x + m - 1) // m) * m


def _int_pow(x, k):
    """x**k for a non-negative compile-time integer k via square-and-multiply.

    Pure VPU multiplies (no EUP transcendentals), exact for integer exponents,
    well-defined for any real base (matches torch.pow integer-exponent
    semantics).
    """
    result = None
    base = x
    while k > 0:
        if k & 1:
            result = base if result is None else result * base
        base = base * base
        k >>= 1
    if result is None:
        return jnp.ones_like(x)
    return result


def _smoothstep_kernel(x_ref, o_ref, *, kstep):
    x = x_ref[...].astype(jnp.float32)     # keep f32 compute even for bf16 I/O
    one_minus = 1.0 - x
    if float(kstep).is_integer() and kstep >= 0:
        # Ratio form: out = 1 / (1 + (x/(1-x))**k)  ==  (1-x)^k / ((1-x)^k + x^k).
        # Limits: x->0 => 1;  x->1 => recip(0)=inf, 1/(1+inf)=0.  Intermediate
        # over/underflow both land on the correct limit, so it matches the
        # a/(a+b) reference within tolerance over the whole real line.
        r = _int_pow(x * pl.reciprocal(one_minus), int(kstep))
        o_ref[...] = pl.reciprocal(1.0 + r).astype(o_ref.dtype)
    else:
        # Non-integer exponent fallback: keep a/(a+b) to match torch.pow
        # float-exponent semantics (NaN for negative bases).
        a = jnp.power(one_minus, kstep)
        b = jnp.power(x, kstep)
        o_ref[...] = (a * pl.reciprocal(a + b)).astype(o_ref.dtype)


def _jnp_smoothstep(x, kstep):
    """Plain-JAX reference math, used only for the (< 1 tile) ragged tail."""
    xf = x.astype(jnp.float32)
    a = jnp.power(1.0 - xf, kstep)
    b = jnp.power(xf, kstep)
    return (a / (a + b)).astype(x.dtype)


def _max_block_rows(itemsize):
    """Largest rows-per-block, chip- and dtype-aware (~constant bytes/block)."""
    try:
        kind = jax.devices()[0].device_kind.lower()
    except Exception:  # pragma: no cover - defensive
        kind = ""
    is_v5e = ("v5 lite" in kind) or ("v5e" in kind) or ("v5litepod" in kind)
    # ~4 MiB blocks by default (puts the ~0.35us/step overhead on the 85-90%
    # roofline plateau, biggest win on v7x's 3.2 TB/s HBM); ~2 MiB on v5e.
    block_bytes = (2 << 20) if is_v5e else (4 << 20)
    return max(SUBLANE, block_bytes // (LANE * itemsize))


def smoothstep(x, kstep=10.0):
    """SmoothStep forward. Matches torch semantics elementwise."""
    orig_shape = x.shape
    orig_dtype = x.dtype
    itemsize = jnp.dtype(orig_dtype).itemsize

    # Sub-32-bit dtypes pack along sublanes: native tile is (pack*8, 128).
    pack = max(1, 4 // itemsize)
    row_align = pack * SUBLANE
    chunk = row_align * LANE                 # elements per native tile

    flat = x.reshape(-1)
    n = flat.shape[0]
    if n == 0:
        return x

    # Ragged handling without a whole-array pad + output slice:
    #   - aligned sizes: zero extra HBM passes;
    #   - ragged sizes:  kernel on the largest tile-aligned prefix, tail in jnp;
    #   - tiny (< 1 tile): pad a single tile (negligible).
    main_n = (n // chunk) * chunk
    pad_to = 0
    tail = None
    if main_n == 0:
        pad_to = chunk - n
        flat_main = jnp.pad(flat, (0, pad_to), constant_values=0.5)
        main_n = chunk
    elif main_n == n:
        flat_main = flat
    else:
        flat_main = flat[:main_n]
        tail = flat[main_n:]

    slab = flat_main.reshape(-1, LANE)       # (rows, 128), rows % row_align == 0
    rows = slab.shape[0]

    # Even number of near-equal blocks so v7x's two TensorCores stay balanced;
    # blocks as large as the per-chip budget allows.
    max_tile = _max_block_rows(itemsize)
    n_blocks = 2 * pl.cdiv(rows, 2 * max_tile)
    row_tile = min(rows, _round_up(pl.cdiv(rows, n_blocks), row_align))
    grid = (pl.cdiv(rows, row_tile),)

    # Double-buffered input + output blocks, plus slack for internal scratch.
    block_bytes = row_tile * LANE * itemsize
    vmem_limit = max(16 << 20, 4 * block_bytes + (2 << 20))

    kernel = functools.partial(_smoothstep_kernel, kstep=float(kstep))

    cost = pl.CostEstimate(
        flops=12 * main_n,
        transcendentals=2 * main_n,
        bytes_accessed=2 * main_n * itemsize,
    )

    out_slab = pl.pallas_call(
        kernel,
        out_shape=jax.ShapeDtypeStruct((rows, LANE), orig_dtype),
        grid_spec=pltpu.PrefetchScalarGridSpec(
            num_scalar_prefetch=0,
            grid=grid,
            in_specs=[pl.BlockSpec((row_tile, LANE), lambda i: (i, 0))],
            out_specs=pl.BlockSpec((row_tile, LANE), lambda i: (i, 0)),
        ),
        compiler_params=pltpu.CompilerParams(
            dimension_semantics=("parallel",),   # v7x: 2 TCs split the grid
            vmem_limit_bytes=int(vmem_limit),
        ),
        cost_estimate=cost,
    )(slab)

    out = out_slab.reshape(-1)
    if pad_to:
        out = out[:n]
    if tail is not None:
        out = jnp.concatenate([out, _jnp_smoothstep(tail, float(kstep))])
    return out.reshape(orig_shape)


if __name__ == "__main__":
    key = jax.random.PRNGKey(0)
    # Small NCHW-like input, values in (0, 1) (the natural smooth-step domain).
    x = jax.random.uniform(
        key, (2, 4, 16, 16), dtype=jnp.float32, minval=0.05, maxval=0.95
    )

    y = jax.block_until_ready(smoothstep(x, kstep=10.0))

    # Reference check in plain JAX (same math as the torch module).
    a = jnp.power(1.0 - x, 10.0)
    b = jnp.power(x, 10.0)
    ref = a / (a + b)
    assert y.shape == x.shape and y.dtype == x.dtype
    assert jnp.allclose(y, ref, atol=1e-6, rtol=1e-5)

    print("KERNEL_OK")
</pallas_src>

<mosaic_0001>
module attributes {stable_mosaic.version = 11 : i64} {
  func.func @_smoothstep_kernel(%arg0: i32, %arg1: memref<8x128xf32, #tpu.memory_space<vmem>>, %arg2: memref<8x128xf32, #tpu.memory_space<vmem>>) attributes {dimension_semantics = [#tpu.dimension_semantics<parallel>], iteration_bounds = array<i64: 2>, scalar_prefetch = 0 : i64, scratch_operands = 0 : i64, tpu.core_type = #tpu.core_type<tc>, window_params = [{transform_indices = @transform_0, window_bounds = array<i64: 8, 128>}, {transform_indices = @transform_1, window_bounds = array<i64: 8, 128>}]} {
    %c0 = arith.constant 0 : index
    %c0_0 = arith.constant 0 : index
    %0 = vector.load %arg1[%c0, %c0_0] : memref<8x128xf32, #tpu.memory_space<vmem>>, vector<8x128xf32>
    %cst = arith.constant 1.000000e+00 : f32
    %1 = vector.broadcast %cst : f32 to vector<8x128xf32>
    %2 = arith.subf %1, %0 : vector<8x128xf32>
    %3 = tpu.reciprocal %2 : vector<8x128xf32> -> vector<8x128xf32>
    %4 = arith.mulf %0, %3 : vector<8x128xf32>
    %5 = arith.mulf %4, %4 : vector<8x128xf32>
    %6 = arith.mulf %5, %5 : vector<8x128xf32>
    %7 = arith.mulf %6, %6 : vector<8x128xf32>
    %8 = arith.mulf %5, %7 : vector<8x128xf32>
    %cst_1 = arith.constant 1.000000e+00 : f32
    %9 = vector.broadcast %cst_1 : f32 to vector<8x128xf32>
    %10 = arith.addf %9, %8 : vector<8x128xf32>
    %11 = tpu.reciprocal %10 : vector<8x128xf32> -> vector<8x128xf32>
    %c0_2 = arith.constant 0 : index
    %c0_3 = arith.constant 0 : index
    %12 = vector.load %arg2[%c0_2, %c0_3] : memref<8x128xf32, #tpu.memory_space<vmem>>, vector<8x128xf32>
    tpu.vector_store %arg2[%c0_2, %c0_3], %11 {strides = array<i32>} : memref<8x128xf32, #tpu.memory_space<vmem>>, vector<8x128xf32>,
    return
  }
  func.func @transform_0(%arg0: i32) -> (i32, i32) {
    %c0_i32 = arith.constant 0 : i32
    %c0_i32_0 = arith.constant 0 : i32
    return %arg0, %c0_i32 : i32, i32
  }
  func.func @transform_1(%arg0: i32) -> (i32, i32) {
    %c0_i32 = arith.constant 0 : i32
    %c0_i32_0 = arith.constant 0 : i32
    return %arg0, %c0_i32 : i32, i32
  }
}

</mosaic_0001>

<bundles_post_ra>
// kernel: tpu_custom_call.1
= control target key start
LH: loop header
LB: loop body
LE: loop exit
PB: predicated region body
PF: predicated region fallthrough
CT: control target
= control target key end

     0   :  { %6 = vsyncpa [#allocation3], 0  ;;  %s558_s0 = inlined_call_operand.hbm [shape: f32[16,128], index: 0, kind: input, shape index: {}]   ;;  %s559_s1 = inlined_call_operand.hbm [shape: f32[16,128], index: 1, kind: output, shape index: {}]  }
   0x1   :  { %8 = vsyncpa [#allocation3 + $0x1], 0 }
   0x2   :  { %9 = vsyncpa [#allocation4], 0 }
   0x3   :  { %11 = vsyncpa [#allocation4 + $0x1], 0  ;;  %s427_s6 = smov 0   ;;  %s429_s7 = smov 0  }
   0x4   :  { %s431_s8 = smov 0   ;;  %s433_s9 = smov 0  }
   0x5 LB: > { %s448_s10 = sadd.s32 4294967295, %s415_s9   ;;  %s257_s11 = sadd.s32 4294967294, %s415_s9   ;;  %s415_s9 = sphi %s433_s9, %s569_s9   ;;  %s411_s8 = sphi %s431_s8, %s568_s8   ;;  %s407_s7 = sphi %s429_s7, %s567_s7   ;;  %s403_s6 = sphi %s427_s6, %s566_s6  }
   0x6   : > { %s452_s12 = sadd.s32 1, %s415_s9   ;;  %s24_s13 = sadd.s32 1, %s411_s8 }
   0x7   : > { %s21_s14 = ssub.s32 %s415_s9, %s452_s12  ;;  %p31_p0 = scmp.ne.s32.totalorder %s411_s8, %s407_s7 }
   0x8   : > { %p22_p1 = scmp.eq.s32.totalorder %s21_s14, 0  ;;  %p32_p2 = scmp.eq.s32.totalorder %s415_s9, 0 }
   0x9   : > { %p37_p3 = scmp.ne.s32.totalorder %s407_s7, %s403_s6  ;;  %p38_p4 = scmp.eq.s32.totalorder %s448_s10, 0 }
   0xa   : > { %s464_s15 = scalar_select %p22_p1, %s411_s8, %s24_s13  }
   0xb   : > { %p466_p5 = por %p32_p2, %p31_p0  ;;  %p470_p6 = por %p38_p4, %p37_p3 }
   0xc   : > { %p61_p7 = scmp.eq.s32.totalorder %s448_s10, 1  ;;  %p67_p8 = scmp.eq.s32.totalorder %s257_s11, 1 }
   0xd   : > { %p281_p10 = scmp.lt.s32.totalorder %s415_s9, 2  ;;  %s87_s20 = sand.u32 1, %s411_s8  }
   0xe   : > { %p477_p11 = por %p61_p7, %p31_p0  ;;  %p481_p12 = por %p67_p8, %p37_p3 }
   0xf   : > { %s261_s21 = sshll.u32 %s415_s9, 3  ;;  %s260_s22 = sshll.u32 %s87_s20, 3 }
  0x10   : > { %s95_s25 = scalar_lea.hbm %s558_s0, %s261_s21  ;;  %s91_s27 = scalar_lea.vmem [#allocation2], %s260_s22 }
  0x11   : > { %s97_s26 = sshll.u32 %s95_s25, 4  ;;  %s99_s28 = sshll.u32 %s91_s27, 4  ;;  %s98_s26 = int_to_ptr.hbm [resolvable:$true] %s97_s26  ;;  %s100_s28 = int_to_ptr.vmem [resolvable:$true] %s99_s28 }
  0x12   : > { %p492_p13 = pnand %p281_p10, %p466_p5  ;;  %p262_p0 = scmp.ge.s32.totalorder %s415_s9, 1 }
  0x13   : > { %p104_p1 = scmp.lt.s32.totalorder %s415_s9, 3  ;;  %s88_s30 = scalar_lea.sflag [#allocation3], %s87_s20 }
  0x14   : > { %s319_s2 = sshra.s32 %s98_s26, 4  ;;  %p323_p3 = pneg %p492_p13  ;;  %s320_s2 = int_to_ptr.hbm [resolvable:$true] %s319_s2 }
  0x15   : > { %s321_s3 = scalar_lea.hbm %s320_s2, 8  ;;  %s326_s11 = scalar_lea.hbm %s558_s0, 16 }
  0x16   : > { %p322_p2 = scmp.ne.s32.totalorder %s320_s2, %s321_s3  ;;  %p327_p5 = scmp.lt.s32.totalorder %s320_s2, %s558_s0 }
  0x17   : > { %p328_p8 = scmp.lt.s32.totalorder %s326_s11, %s321_s3 }
  0x18   : > { %p324_p4 = pnand %p323_p3, %p322_p2 }
  0x19   : > { %p329_p10 = por %p328_p8, %p327_p5 }
  0x1a   : > { %p325_p7 = pneg %p324_p4 }
  0x1c   : > { %p330_p9 = pnand %p329_p10, %p325_p7 }
  0x1e   : > { %333 = shalt.err (!%p330_p9)
}
  0x1f   : > { %276 = dma.hbm_to_vmem [thread:$0]  (!%p492_p13), %s98_s26, 128, %s100_s28, %s88_s30  }
  0x20   : > { %p105_p2 = pnand %p262_p0, %p104_p1 }
  0x21   : > { %s513_s16 = sand.u32 (!%p105_p2), 1, %s407_s7  }
  0x22   : > { %108 = sbr.rel (%p105_p2) target bundleno = 92 (0x5c), region = 24  ;;  %s263_s20 = sshll.u32 (!%p105_p2), %s513_s16, 3 }
  0x23   : > { %s111_s21 = scalar_lea.sflag (!%p105_p2), [#allocation3], %s513_s16  ;;  %s114_s22 = scalar_lea.vmem (!%p105_p2), [#allocation2], %s263_s20 }
  0x27   : > { %394 = dma.done.wait (%p470_p6), %s111_s21, 128  }
  0x28   : > { %396 = vsyncadd (%p470_p6), %s111_s21, 4294967168  ;;  %v134_v0 = vld [vmem:[%s114_s22] sm:$0xff]  ;;  %s266_s17 = sshll.u32 %s448_s10, 3  ;;  %s133_s26 = scalar_lea.vmem [#allocation5], %s263_s20 }
  0x29   : > { %v135_v1 = vsub.f32 1.0, %v134_v0  ;;  %s182_s25 = scalar_lea.hbm %s559_s1, %s266_s17  ;;  %s184_s27 = sshll.u32 %s133_s26, 4  ;;  %s185_s27 = int_to_ptr.vmem [resolvable:$true] %s184_s27 }
  0x2a   : > { %s186_s28 = sshll.u32 %s182_s25, 4  ;;  %s172_s10 = scalar_lea.sflag [#allocation4], %s513_s16  ;;  %s187_s28 = int_to_ptr.hbm [resolvable:$true] %s186_s28 }
  0x2b   : > { %315 = vrcp.f32 %v135_v1  ;;  %v147_v4 = vand.u32 2147483648, %v135_v1  ;;  %vm141_vm0 = vweird.f32 %v135_v1  ;;  %v145_v6 = vand.u32 2147483647, %v135_v1  ;;  %s363_s29 = sshra.s32 %s187_s28, 4  ;;  %s369_s4 = scalar_lea.hbm %s559_s1, 16  ;;  %s364_s29 = int_to_ptr.hbm [resolvable:$true] %s363_s29 }
  0x2c   : > { %s365_s30 = scalar_lea.hbm %s364_s29, 8  ;;  %p370_p0 = scmp.lt.s32.totalorder %s364_s29, %s559_s1 }
  0x2d   : > { %v148_v8 = vor.u32 1.1754944e-38, %v147_v4  ;;  %vm146_vm3 = vcmp.eq.f32.partialorder %v145_v6, 8.507059e+37  ;;  %p366_p6 = scmp.ne.s32.totalorder %s364_s29, %s365_s30  ;;  %p371_p1 = scmp.lt.s32.totalorder %s369_s4, %s365_s30 }
  0x2f   : > { %p367_p9 = pnand %p366_p6, %p477_p11  ;;  %p372_p3 = por %p371_p1, %p370_p0 }
  0x31   : > { %v316_v2 = vpop.eup %315  ;;  %p368_p13 = pneg %p367_p9 }
  0x32   : > { %v137_v3 = vmul.f32 %v316_v2, %v135_v1  ;;  %vm142_vm1 = vweird.f32 %v316_v2 }
  0x33   : > { %vm143_vm2 = vmor %vm141_vm0, %vm142_vm1  ;;  %p373_p4 = pnand %p372_p3, %p368_p13 }
  0x34   : > { %v138_v5 = vsub.f32 1.0, %v137_v3 }
  0x36   : > { %v139_v7 = vmul.f32 %v316_v2, %v138_v5 }
  0x38   : > { %v140_v9 = vadd.f32 %v316_v2, %v139_v7 }
  0x3a   : > { %v144_v10 = vsel %vm143_vm2, %v316_v2, %v140_v9 }
  0x3b   : > { %v149_v11 = vsel %vm146_vm3, %v148_v8, %v144_v10 }
  0x3c   : > { %v150_v12 = vmul.f32 %v149_v11, %v134_v0 }
  0x3e   : > { %v151_v13 = vmul.f32 %v150_v12, %v150_v12 }
  0x40   : > { %v152_v14 = vmul.f32 %v151_v13, %v151_v13 }
  0x42   : > { %v153_v15 = vmul.f32 %v152_v14, %v152_v14 }
  0x44   : > { %v154_v16 = vmul.f32 %v153_v15, %v151_v13 }
  0x46   : > { %v155_v17 = vadd.f32 1.0, %v154_v16 }
  0x48   : > { %317 = vrcp.f32 %v155_v17  ;;  %v167_v20 = vand.u32 2147483648, %v155_v17  ;;  %vm161_vm4 = vweird.f32 %v155_v17  ;;  %v165_v22 = vand.u32 2147483647, %v155_v17 }
  0x4a   : > { %v168_v24 = vor.u32 1.1754944e-38, %v167_v20  ;;  %vm166_vm7 = vcmp.eq.f32.partialorder %v165_v22, 8.507059e+37 }
  0x4e   : > { %v318_v18 = vpop.eup %317 }
  0x4f   : > { %v157_v19 = vmul.f32 %v318_v18, %v155_v17  ;;  %vm162_vm5 = vweird.f32 %v318_v18 }
  0x50   : > { %vm163_vm6 = vmor %vm161_vm4, %vm162_vm5 }
  0x51   : > { %v158_v21 = vsub.f32 1.0, %v157_v19 }
  0x53   : > { %v159_v23 = vmul.f32 %v318_v18, %v158_v21 }
  0x55   : > { %v160_v25 = vadd.f32 %v318_v18, %v159_v23 }
  0x57   : > { %v164_v26 = vsel %vm163_vm6, %v318_v18, %v160_v25 }
  0x58   : > { %v169_v27 = vsel %vm166_vm7, %v168_v24, %v164_v26 }
  0x59   : > { %170 = vst [vmem:[%s133_s26] sm:$0xff] %v169_v27 }
  0x5a   : > { %376 = shalt.err (!%p373_p4)
}
  0x5b   : > { %271 = dma.vmem_to_hbm [thread:$0]  (%p477_p11), %s185_s27, 128, %s187_s28, %s172_s10  }
  0x5c PF: > { %s198_s13 = sand.u32 1, %s403_s6   ;;  %p565_p7 = scmp.ge.s32.totalorder %s415_s9, 2 }
  0x5d   : > { %s199_s14 = scalar_lea.sflag [#allocation4], %s198_s13 }
  0x5e   : > { %p278_p5 = pnand %p565_p7, %p481_p12 }
  0x60   : > { %p279_p8 = pneg %p278_p5 }
  0x62   : > { %398 = dma.done.wait (%p279_p8), %s199_s14, 128  }
  0x63   : > { %400 = vsyncadd (%p279_p8), %s199_s14, 4294967168  ;;  %p14_p10 = scmp.ge.s32.totalorder %s452_s12, 4   ;;  %s566_s6 = smov %s407_s7 }
  0x64   : > { %s567_s7 = smov %s411_s8  ;;  %s568_s8 = smov %s464_s15 }
  0x65   : > { %s569_s9 = smov %s452_s12  ;;  %16 = sbr.rel (!%p14_p10) target bundleno = 5 (0x5), region = 69 }
  0x6a   :  { %205 = vsyncpa [#allocation3], 1 }
  0x6b   :  { %207 = vsyncpa [#allocation3 + $0x1], 1 }
  0x6c   :  { %208 = vsyncpa [#allocation4], 1 }
  0x6d   :  { %210 = vsyncpa [#allocation4 + $0x1], 1 }

</bundles_post_ra>
